<compile_context>
chip_gen: v5e
topology: v5e:2x2
jax: 0.10.0
libtpu: 0.0.40
codegen_flags: <defaults>
</compile_context>

<pallas_src>
import functools

import jax
import jax.numpy as jnp
from jax.experimental import pallas as pl
from jax.experimental.pallas import tpu as pltpu


# ---------------------------------------------------------------------------
# Kernel
# ---------------------------------------------------------------------------
def _cnn_encoder_kernel(x_ref, w_ref, b_ref, mask_ref, o_ref, *,
                        num_taps, fuse_taps, compute_dtype):
    """Fused multi-gram conv -> additive mask -> max_t -> bias -> ReLU.

    x_ref    : (Bt, S, D) f32 input tile
    w_ref    : (G*D, N) bf16 (fused im2col weights) or (G, D, N) bf16
    b_ref    : (1, N)   f32 concatenated biases
    mask_ref : (1, S, N) f32 additive mask (0 where window valid, -1e30 else)
    o_ref    : (1, Bt, N)
    """
    bt, s, d = x_ref.shape
    n = o_ref.shape[-1]
    r = bt * s

    # Layout no-op when S % 8 == 0 (sublane aligned).
    x2d = x_ref[...].reshape(r, d)                       # (R, D) f32

    # Tap i: contribution of input row (b, t+i) belongs at output row (b, t),
    # i.e. roll rows up by i.  Wrapped / cross-batch rows only ever reach
    # positions that are masked (-1e30) or hit an all-zero tap of that branch,
    # and the wrapper zero-pads ragged batches so they are always finite.
    taps = [x2d if i == 0 else pltpu.roll(x2d, shift=r - i, axis=0)
            for i in range(num_taps)]

    if fuse_taps:
        # im2col: single MXU call with K = G*D; tap accumulation happens in
        # the MXU accumulator, no f32 (R, N) adds on the VPU.
        lhs = jnp.concatenate(taps, axis=1).astype(compute_dtype)   # (R, G*D)
        acc = jax.lax.dot_general(
            lhs, w_ref[...],
            dimension_numbers=(((1,), (0,)), ((), ())),
            preferred_element_type=jnp.float32)                     # (R, N)
    else:
        acc = None
        for i in range(num_taps):
            zi = jax.lax.dot_general(
                taps[i].astype(compute_dtype), w_ref[i],
                dimension_numbers=(((1,), (0,)), ((), ())),
                preferred_element_type=jnp.float32)                 # (R, N)
            acc = zi if acc is None else acc + zi

    acc = acc.reshape(bt, s, n) + mask_ref[...]          # additive -1e30 mask
    m = jnp.max(acc, axis=1)                             # (Bt, N)
    # Bias + ReLU hoisted past the max (bias is t-invariant, ReLU monotone).
    o_ref[0] = jnp.maximum(m + b_ref[...], 0.0).astype(o_ref.dtype)


# ---------------------------------------------------------------------------
# Wrapper helpers
# ---------------------------------------------------------------------------
def _vmem_limit_bytes():
    """~75% of per-core physical VMEM (v5e/v6e: 128 MiB, v7x: 64 MiB)."""
    try:
        cap = int(pltpu.get_tpu_info().vmem_capacity_bytes)
    except Exception:
        cap = 64 * 1024 * 1024            # conservative (v7x-safe) fallback
    return int(max(16 * 1024 * 1024, min(int(cap * 0.75), 100 * 1024 * 1024)))


def _choose_block_b(B, S, D, N, G, vmem_limit, fuse_taps):
    """Batch tile from a VMEM budget; the f32 (Bt,S,N) intermediates dominate."""
    if fuse_taps:
        per_b = (2 * S * D * 4            # double-buffered f32 x tile
                 + S * D * 4              # f32 x2d working view
                 + G * S * D * 4          # rolled f32 taps / concat
                 + G * S * D * 2          # bf16 im2col LHS
                 + 3 * S * N * 4)         # live f32 (S, N) temps (acc, mask-add, max)
    else:
        per_b = (2 * S * D * 4
                 + S * D * 4
                 + S * D * 4              # rolled f32 tap
                 + S * D * 2              # bf16 MXU LHS
                 + 3 * S * N * 4)
    fixed = (G * D * N * 2                # bf16 weights (single-buffered)
             + S * N * 4 + N * 4          # mask + bias
             + (2 << 20))                 # output / pipeline / internal slack
    budget = int(vmem_limit * 0.6) - fixed
    block_b = max(1, budget // max(1, per_b))
    block_b = min(block_b, B)
    if B >= 2:
        # Keep >= 2 grid steps so the "parallel" axis can shard over v7x's 2 TCs.
        block_b = min(block_b, pl.cdiv(B, 2))
    return int(max(1, block_b))


def _build_mask(S, grams, C):
    """(1, S, N) additive f32 mask: 0 where window [t, t+gram) fits, -1e30 else."""
    t = jnp.arange(S)
    cols = []
    for g in grams:
        col = jnp.where(t <= (S - g), 0.0, -1e30).astype(jnp.float32)   # (S,)
        cols.append(jnp.broadcast_to(col[:, None], (S, C)))
    return jnp.concatenate(cols, axis=1)[None]                           # (1,S,N)


# ---------------------------------------------------------------------------
# Forward wrapper
# ---------------------------------------------------------------------------
def cnn_encoder_forward(x, w_packed, b_packed, grams, *, block_b=None,
                        compute_dtype=jnp.bfloat16):
    """x: (B, S, D); w_packed: (max_gram, D, 4*C) f32; b_packed: (1, 4*C) -> (B, 4*C)."""
    B, S, D = x.shape
    G, Dw, N = w_packed.shape
    assert Dw == D
    assert max(grams) == G and S >= G, "sequence length must be >= max_gram"
    assert N % len(grams) == 0
    C = N // len(grams)

    # Fuse all taps into one MXU call when the fused output width is small
    # (per-tap matmuls would waste the 256/128-wide MXU output tile).
    fuse_taps = N <= 256

    vmem_limit = _vmem_limit_bytes()
    if block_b is None:
        block_b = _choose_block_b(B, S, D, N, G, vmem_limit, fuse_taps)

    # Grid-invariant operands, pre-cast once: bf16 weights halve their DMA and
    # VMEM footprint and remove the per-step in-kernel cast.
    if fuse_taps:
        w_in = w_packed.reshape(G * D, N).astype(compute_dtype)   # rows i*D:(i+1)*D = tap i
    else:
        w_in = w_packed.astype(compute_dtype)
    b_in = b_packed.astype(jnp.float32)
    mask = _build_mask(S, grams, C)

    # Zero-pad the batch to a multiple of block_b so every tile is fully
    # defined (no undefined padded rows can leak through the roll).
    num_tiles = pl.cdiv(B, block_b)
    PB = num_tiles * block_b
    x_in = x if PB == B else jnp.pad(x, ((0, PB - B), (0, 0), (0, 0)))

    kernel = functools.partial(_cnn_encoder_kernel, num_taps=G,
                               fuse_taps=fuse_taps, compute_dtype=compute_dtype)

    def call(use_buffered):
        def inv_spec(shape):
            nd = len(shape)
            kw = {"pipeline_mode": pl.Buffered(1)} if use_buffered else {}
            return pl.BlockSpec(shape, lambda i, _nd=nd: (0,) * _nd, **kw)

        return pl.pallas_call(
            kernel,
            # (num_tiles, block_b, N): stored block always equals the array's
            # last two dims -> no sublane-alignment hazard for small tiles.
            out_shape=jax.ShapeDtypeStruct((num_tiles, block_b, N), x.dtype),
            grid_spec=pltpu.PrefetchScalarGridSpec(
                num_scalar_prefetch=0,
                grid=(num_tiles,),
                in_specs=[
                    pl.BlockSpec((block_b, S, D), lambda i: (i, 0, 0)),
                    inv_spec(w_in.shape),       # weights: grid-invariant
                    inv_spec(b_in.shape),       # bias:    grid-invariant
                    inv_spec(mask.shape),       # mask:    grid-invariant
                ],
                out_specs=pl.BlockSpec((1, block_b, N), lambda i: (i, 0, 0)),
            ),
            compiler_params=pltpu.CompilerParams(
                dimension_semantics=("parallel",),   # shard batch tiles over TCs
                vmem_limit_bytes=vmem_limit,
            ),
        )(x_in, w_in, b_in, mask)

    try:
        out = call(use_buffered=True)
    except Exception:
        # Fallback for jax builds that reject pipeline_mode / Buffered(1).
        out = call(use_buffered=False)

    return out.reshape(PB, N)[:B]


# ---------------------------------------------------------------------------
# Params (PyTorch-equivalent init) and plain-JAX reference
# ---------------------------------------------------------------------------
def init_params(key, emb_dim, min_gram=2, max_gram=5):
    """Deterministic init mimicking nn.Conv2d default (uniform +-1/sqrt(fan_in))."""
    output_dim = emb_dim // 4
    params = []
    for idx, gram in enumerate(range(min_gram, max_gram + 1)):
        kw, kb = jax.random.split(jax.random.fold_in(key, idx))
        fan_in = 1 * gram * emb_dim
        bound = 1.0 / (fan_in ** 0.5)
        # PyTorch weight layout is (C, 1, gram, D); store as (gram, D, C).
        w_pt = jax.random.uniform(kw, (output_dim, 1, gram, emb_dim),
                                  minval=-bound, maxval=bound, dtype=jnp.float32)
        w = jnp.transpose(w_pt[:, 0, :, :], (1, 2, 0))          # (gram, D, C)
        b = jax.random.uniform(kb, (1, output_dim),
                               minval=-bound, maxval=bound, dtype=jnp.float32)
        params.append((gram, w, b))
    return params


def pack_params(params):
    """Pack per-gram (gram, w:(gram,D,C), b:(1,C)) into fused tensors."""
    grams = tuple(g for g, _, _ in params)
    max_gram = max(grams)
    D = params[0][1].shape[1]
    C = params[0][1].shape[2]
    N = C * len(params)
    w_packed = jnp.zeros((max_gram, D, N), jnp.float32)
    biases = []
    for j, (g, w, b) in enumerate(params):
        w_packed = w_packed.at[:g, :, j * C:(j + 1) * C].set(w.astype(jnp.float32))
        biases.append(b.astype(jnp.float32))
    b_packed = jnp.concatenate(biases, axis=1)                   # (1, N)
    return grams, w_packed, b_packed


def cnn_encoder_reference(x, params, compute_dtype=jnp.float32):
    """Plain-JAX reference matching the PyTorch forward (per-branch conv)."""
    outs = []
    B, S, D = x.shape
    xc = x.astype(compute_dtype)
    for gram, w, b in params:
        L = S - gram + 1
        wc = w.astype(compute_dtype)
        acc = jnp.zeros((B, L, w.shape[2]), jnp.float32)
        for i in range(gram):
            acc = acc + jax.lax.dot_general(
                xc[:, i:i + L, :], wc[i],
                dimension_numbers=(((2,), (0,)), ((), ())),
                preferred_element_type=jnp.float32)
        acc = acc + b[None, :, :]
        outs.append(jnp.max(jnp.maximum(acc, 0.0), axis=1))
    return jnp.concatenate(outs, axis=1)


if __name__ == "__main__":
    key = jax.random.PRNGKey(0)
    B, S, emb_dim = 2, 8, 32          # hidden_Size = 32 -> output_dim per gram = 8
    kx, kp = jax.random.split(key)
    x = jax.random.normal(kx, (B, S, emb_dim), dtype=jnp.float32)

    params = init_params(kp, emb_dim)
    grams, w_packed, b_packed = pack_params(params)

    out = cnn_encoder_forward(x, w_packed, b_packed, grams)
    out = jax.block_until_ready(out)
    assert out.shape == (B, emb_dim), out.shape

    # Tight check vs a reference using the same bf16 MXU operands (logic check).
    ref_bf16 = cnn_encoder_reference(x, params, compute_dtype=jnp.bfloat16)
    assert jnp.allclose(out, ref_bf16, atol=1e-4, rtol=1e-4), "mismatch vs bf16 reference"
    # Loose check vs exact f32 PyTorch-equivalent semantics (bf16 rounding only).
    ref_f32 = cnn_encoder_reference(x, params, compute_dtype=jnp.float32)
    assert jnp.allclose(out, ref_f32, atol=5e-2, rtol=5e-2), "mismatch vs f32 reference"

    print("KERNEL_OK")
</pallas_src>

<mosaic_0001>
module attributes {stable_mosaic.version = 11 : i64} {
  func.func @_cnn_encoder_kernel(%arg0: i32, %arg1: memref<1x8x32xf32, #tpu.memory_space<vmem>>, %arg2: memref<160x32xbf16, #tpu.memory_space<vmem>>, %arg3: memref<1x32xf32, #tpu.memory_space<vmem>>, %arg4: memref<1x8x32xf32, #tpu.memory_space<vmem>>, %arg5: memref<1x1x32xf32, #tpu.memory_space<vmem>>) attributes {dimension_semantics = [#tpu.dimension_semantics<parallel>], iteration_bounds = array<i64: 2>, scalar_prefetch = 0 : i64, scratch_operands = 0 : i64, tpu.core_type = #tpu.core_type<tc>, window_params = [{transform_indices = @transform_0, window_bounds = array<i64: 1, 8, 32>}, {pipeline_mode = #tpu.pipeline_mode<synchronous>, transform_indices = @transform_1, window_bounds = array<i64: 160, 32>}, {pipeline_mode = #tpu.pipeline_mode<synchronous>, transform_indices = @transform_2, window_bounds = array<i64: 1, 32>}, {pipeline_mode = #tpu.pipeline_mode<synchronous>, transform_indices = @transform_3, window_bounds = array<i64: 1, 8, 32>}, {transform_indices = @transform_4, window_bounds = array<i64: 1, 1, 32>}]} {
    %c0 = arith.constant 0 : index
    %c0_0 = arith.constant 0 : index
    %c0_1 = arith.constant 0 : index
    %0 = vector.load %arg1[%c0, %c0_0, %c0_1] : memref<1x8x32xf32, #tpu.memory_space<vmem>>, vector<1x8x32xf32>
    %1 = vector.shape_cast %0 : vector<1x8x32xf32> to vector<8x32xf32>
    %c7_i32 = arith.constant 7 : i32
    %2 = tpu.dynamic_rotate %1 by %c7_i32 dim 0 : vector<8x32xf32>, i32 -> vector<8x32xf32>
    %c6_i32 = arith.constant 6 : i32
    %3 = tpu.dynamic_rotate %1 by %c6_i32 dim 0 : vector<8x32xf32>, i32 -> vector<8x32xf32>
    %c5_i32 = arith.constant 5 : i32
    %4 = tpu.dynamic_rotate %1 by %c5_i32 dim 0 : vector<8x32xf32>, i32 -> vector<8x32xf32>
    %c4_i32 = arith.constant 4 : i32
    %5 = tpu.dynamic_rotate %1 by %c4_i32 dim 0 : vector<8x32xf32>, i32 -> vector<8x32xf32>
    %6 = tpu.concatenate %1, %2, %3, %4, %5 in 1 : vector<8x32xf32>, vector<8x32xf32>, vector<8x32xf32>, vector<8x32xf32>, vector<8x32xf32> -> vector<8x160xf32>
    %7 = arith.truncf %6 : vector<8x160xf32> to vector<8x160xbf16>
    %c0_2 = arith.constant 0 : index
    %c0_3 = arith.constant 0 : index
    %8 = vector.load %arg2[%c0_2, %c0_3] : memref<160x32xbf16, #tpu.memory_space<vmem>>, vector<160x32xbf16>
    %cst = arith.constant dense<0.000000e+00> : vector<8x32xf32>
    %9 = tpu.matmul %7, %8, %cst {dimension_numbers = #tpu.dot_dimension_numbers<[1], [0], [0], [1], [0, 0, 1, 1], [], []>} : vector<8x160xbf16>, vector<160x32xbf16>, vector<8x32xf32> -> vector<8x32xf32>
    %10 = vector.shape_cast %9 : vector<8x32xf32> to vector<1x8x32xf32>
    %c0_4 = arith.constant 0 : index
    %c0_5 = arith.constant 0 : index
    %c0_6 = arith.constant 0 : index
    %11 = vector.load %arg4[%c0_4, %c0_5, %c0_6] : memref<1x8x32xf32, #tpu.memory_space<vmem>>, vector<1x8x32xf32>
    %12 = arith.addf %10, %11 : vector<1x8x32xf32>
    %cst_7 = arith.constant dense<0xFF800000> : vector<1x32xf32>
    %13 = vector.multi_reduction <maximumf>, %12, %cst_7 [1] : vector<1x8x32xf32> to vector<1x32xf32>
    %c0_8 = arith.constant 0 : index
    %c0_9 = arith.constant 0 : index
    %14 = vector.load %arg3[%c0_8, %c0_9] : memref<1x32xf32, #tpu.memory_space<vmem>>, vector<1x32xf32>
    %15 = arith.addf %13, %14 : vector<1x32xf32>
    %cst_10 = arith.constant 0.000000e+00 : f32
    %16 = vector.broadcast %cst_10 : f32 to vector<1x32xf32>
    %17 = arith.maximumf %15, %16 : vector<1x32xf32>
    %c0_11 = arith.constant 0 : index
    %c0_12 = arith.constant 0 : index
    %c0_13 = arith.constant 0 : index
    %18 = vector.load %arg5[%c0_11, %c0_12, %c0_13] : memref<1x1x32xf32, #tpu.memory_space<vmem>>, vector<1x1x32xf32>
    %19 = vector.shape_cast %18 : vector<1x1x32xf32> to vector<1x32xf32>
    %20 = vector.shape_cast %17 : vector<1x32xf32> to vector<1x1x32xf32>
    tpu.vector_store %arg5[%c0_11, %c0_12, %c0_13], %20 {strides = array<i32>} : memref<1x1x32xf32, #tpu.memory_space<vmem>>, vector<1x1x32xf32>,
    return
  }
  func.func @transform_0(%arg0: i32) -> (i32, i32, i32) {
    %c0_i32 = arith.constant 0 : i32
    %c0_i32_0 = arith.constant 0 : i32
    %c0_i32_1 = arith.constant 0 : i32
    return %arg0, %c0_i32, %c0_i32_0 : i32, i32, i32
  }
  func.func @transform_1(%arg0: i32) -> (i32, i32) {
    %c0_i32 = arith.constant 0 : i32
    %c0_i32_0 = arith.constant 0 : i32
    %c0_i32_1 = arith.constant 0 : i32
    return %c0_i32, %c0_i32_0 : i32, i32
  }
  func.func @transform_2(%arg0: i32) -> (i32, i32) {
    %c0_i32 = arith.constant 0 : i32
    %c0_i32_0 = arith.constant 0 : i32
    %c0_i32_1 = arith.constant 0 : i32
    return %c0_i32, %c0_i32_0 : i32, i32
  }
  func.func @transform_3(%arg0: i32) -> (i32, i32, i32) {
    %c0_i32 = arith.constant 0 : i32
    %c0_i32_0 = arith.constant 0 : i32
    %c0_i32_1 = arith.constant 0 : i32
    %c0_i32_2 = arith.constant 0 : i32
    return %c0_i32, %c0_i32_0, %c0_i32_1 : i32, i32, i32
  }
  func.func @transform_4(%arg0: i32) -> (i32, i32, i32) {
    %c0_i32 = arith.constant 0 : i32
    %c0_i32_0 = arith.constant 0 : i32
    %c0_i32_1 = arith.constant 0 : i32
    return %arg0, %c0_i32, %c0_i32_0 : i32, i32, i32
  }
}

module attributes {stable_mosaic.version = 11 : i64} {
  func.func @_cnn_encoder_kernel(%arg0: i32, %arg1: memref<1x8x32xf32, #tpu.memory_space<vmem>>, %arg2: memref<160x32xbf16, #tpu.memory_space<vmem>>, %arg3: memref<1x32xf32, #tpu.memory_space<vmem>>, %arg4: memref<1x8x32xf32, #tpu.memory_space<vmem>>, %arg5: memref<1x1x32xf32, #tpu.memory_space<vmem>>) attributes {dimension_semantics = [#tpu.dimension_semantics<parallel>], iteration_bounds = array<i64: 2>, scalar_prefetch = 0 : i64, scratch_operands = 0 : i64, tpu.core_type = #tpu.core_type<tc>, window_params = [{transform_indices = @transform_0, window_bounds = array<i64: 1, 8, 32>}, {pipeline_mode = #tpu.pipeline_mode<synchronous>, transform_indices = @transform_1, window_bounds = array<i64: 160, 32>}, {pipeline_mode = #tpu.pipeline_mode<synchronous>, transform_indices = @transform_2, window_bounds = array<i64: 1, 32>}, {pipeline_mode = #tpu.pipeline_mode<synchronous>, transform_indices = @transform_3, window_bounds = array<i64: 1, 8, 32>}, {transform_indices = @transform_4, window_bounds = array<i64: 1, 1, 32>}]} {
    %c0 = arith.constant 0 : index
    %c0_0 = arith.constant 0 : index
    %c0_1 = arith.constant 0 : index
    %0 = vector.load %arg1[%c0, %c0_0, %c0_1] : memref<1x8x32xf32, #tpu.memory_space<vmem>>, vector<1x8x32xf32>
    %1 = vector.shape_cast %0 : vector<1x8x32xf32> to vector<8x32xf32>
    %c7_i32 = arith.constant 7 : i32
    %2 = tpu.dynamic_rotate %1 by %c7_i32 dim 0 : vector<8x32xf32>, i32 -> vector<8x32xf32>
    %c6_i32 = arith.constant 6 : i32
    %3 = tpu.dynamic_rotate %1 by %c6_i32 dim 0 : vector<8x32xf32>, i32 -> vector<8x32xf32>
    %c5_i32 = arith.constant 5 : i32
    %4 = tpu.dynamic_rotate %1 by %c5_i32 dim 0 : vector<8x32xf32>, i32 -> vector<8x32xf32>
    %c4_i32 = arith.constant 4 : i32
    %5 = tpu.dynamic_rotate %1 by %c4_i32 dim 0 : vector<8x32xf32>, i32 -> vector<8x32xf32>
    %6 = tpu.concatenate %1, %2, %3, %4, %5 in 1 : vector<8x32xf32>, vector<8x32xf32>, vector<8x32xf32>, vector<8x32xf32>, vector<8x32xf32> -> vector<8x160xf32>
    %7 = arith.truncf %6 : vector<8x160xf32> to vector<8x160xbf16>
    %c0_2 = arith.constant 0 : index
    %c0_3 = arith.constant 0 : index
    %8 = vector.load %arg2[%c0_2, %c0_3] : memref<160x32xbf16, #tpu.memory_space<vmem>>, vector<160x32xbf16>
    %cst = arith.constant dense<0.000000e+00> : vector<8x32xf32>
    %9 = tpu.matmul %7, %8, %cst {dimension_numbers = #tpu.dot_dimension_numbers<[1], [0], [0], [1], [0, 0, 1, 1], [], []>} : vector<8x160xbf16>, vector<160x32xbf16>, vector<8x32xf32> -> vector<8x32xf32>
    %10 = vector.shape_cast %9 : vector<8x32xf32> to vector<1x8x32xf32>
    %c0_4 = arith.constant 0 : index
    %c0_5 = arith.constant 0 : index
    %c0_6 = arith.constant 0 : index
    %11 = vector.load %arg4[%c0_4, %c0_5, %c0_6] : memref<1x8x32xf32, #tpu.memory_space<vmem>>, vector<1x8x32xf32>
    %12 = arith.addf %10, %11 : vector<1x8x32xf32>
    %cst_7 = arith.constant dense<0xFF800000> : vector<1x32xf32>
    %13 = vector.multi_reduction <maximumf>, %12, %cst_7 [1] : vector<1x8x32xf32> to vector<1x32xf32>
    %c0_8 = arith.constant 0 : index
    %c0_9 = arith.constant 0 : index
    %14 = vector.load %arg3[%c0_8, %c0_9] : memref<1x32xf32, #tpu.memory_space<vmem>>, vector<1x32xf32>
    %15 = arith.addf %13, %14 : vector<1x32xf32>
    %cst_10 = arith.constant 0.000000e+00 : f32
    %16 = vector.broadcast %cst_10 : f32 to vector<1x32xf32>
    %17 = arith.maximumf %15, %16 : vector<1x32xf32>
    %c0_11 = arith.constant 0 : index
    %c0_12 = arith.constant 0 : index
    %c0_13 = arith.constant 0 : index
    %18 = vector.load %arg5[%c0_11, %c0_12, %c0_13] : memref<1x1x32xf32, #tpu.memory_space<vmem>>, vector<1x1x32xf32>
    %19 = vector.shape_cast %18 : vector<1x1x32xf32> to vector<1x32xf32>
    %20 = vector.shape_cast %17 : vector<1x32xf32> to vector<1x1x32xf32>
    tpu.vector_store %arg5[%c0_11, %c0_12, %c0_13], %20 {strides = array<i32>} : memref<1x1x32xf32, #tpu.memory_space<vmem>>, vector<1x1x32xf32>,
    return
  }
  func.func @transform_0(%arg0: i32) -> (i32, i32, i32) {
    %c0_i32 = arith.constant 0 : i32
    %c0_i32_0 = arith.constant 0 : i32
    %c0_i32_1 = arith.constant 0 : i32
    return %arg0, %c0_i32, %c0_i32_0 : i32, i32, i32
  }
  func.func @transform_1(%arg0: i32) -> (i32, i32) {
    %c0_i32 = arith.constant 0 : i32
    %c0_i32_0 = arith.constant 0 : i32
    %c0_i32_1 = arith.constant 0 : i32
    return %c0_i32, %c0_i32_0 : i32, i32
  }
  func.func @transform_2(%arg0: i32) -> (i32, i32) {
    %c0_i32 = arith.constant 0 : i32
    %c0_i32_0 = arith.constant 0 : i32
    %c0_i32_1 = arith.constant 0 : i32
    return %c0_i32, %c0_i32_0 : i32, i32
  }
  func.func @transform_3(%arg0: i32) -> (i32, i32, i32) {
    %c0_i32 = arith.constant 0 : i32
    %c0_i32_0 = arith.constant 0 : i32
    %c0_i32_1 = arith.constant 0 : i32
    %c0_i32_2 = arith.constant 0 : i32
    return %c0_i32, %c0_i32_0, %c0_i32_1 : i32, i32, i32
  }
  func.func @transform_4(%arg0: i32) -> (i32, i32, i32) {
    %c0_i32 = arith.constant 0 : i32
    %c0_i32_0 = arith.constant 0 : i32
    %c0_i32_1 = arith.constant 0 : i32
    return %arg0, %c0_i32, %c0_i32_0 : i32, i32, i32
  }
}

</mosaic_0001>

<bundles_post_ra>
// kernel: tpu_custom_call.1
= control target key start
LH: loop header
LB: loop body
LE: loop exit
PB: predicated region body
PF: predicated region fallthrough
CT: control target
= control target key end

     0   :  { %9 = vsyncpa [#allocation3], 0  ;;  %s725_s0 = inlined_call_operand.vmem [shape: f32[2,8,32], index: 0, kind: input, shape index: {}]   ;;  %s726_s1 = inlined_call_operand.vmem [shape: bf16[160,32], index: 1, kind: input, shape index: {}]   ;;  %s727_s2 = inlined_call_operand.vmem [shape: f32[1,32], index: 2, kind: input, shape index: {}]   ;;  %s728_s3 = inlined_call_operand.vmem [shape: f32[1,8,32], index: 3, kind: input, shape index: {}]   ;;  %s729_s4 = inlined_call_operand.hbm [shape: f32[2,1,32], index: 4, kind: output, shape index: {}]  }
   0x1   :  { %11 = vsyncpa [#allocation3 + $0x1], 0  ;;  %s601_s15 = smov 0   ;;  %s603_s16 = smov 0  }
   0x2   :  { %s605_s17 = smov 0   ;;  %s607_s18 = smov 0  }
   0x3 LB: > { %s622_s19 = sadd.s32 4294967295, %s571_s18   ;;  %s409_s20 = sadd.s32 4294967294, %s571_s18   ;;  %s571_s18 = sphi %s607_s18, %s735_s18   ;;  %s567_s17 = sphi %s605_s17, %s734_s17   ;;  %s563_s16 = sphi %s603_s16, %s733_s16   ;;  %s559_s15 = sphi %s601_s15, %s732_s15  }
   0x4   : > { %s626_s21 = sadd.s32 1, %s571_s18   ;;  %s113_s22 = sadd.s32 1, %s567_s17 }
   0x5   : > { %s110_s23 = ssub.s32 %s571_s18, %s626_s21  ;;  %p123_p0 = scmp.ne.s32.totalorder %s567_s17, %s563_s16 }
   0x6   : > { %p111_p1 = scmp.eq.s32.totalorder %s110_s23, 0  ;;  %p124_p2 = scmp.eq.s32.totalorder %s622_s19, 1 }
   0x7   : > { %p129_p3 = scmp.ne.s32.totalorder %s563_s16, %s559_s15  ;;  %p130_p4 = scmp.eq.s32.totalorder %s409_s20, 1 }
   0x8   : > { %s637_s24 = scalar_select %p111_p1, %s567_s17, %s113_s22  }
   0x9   : > { %p639_p5 = por %p124_p2, %p123_p0  ;;  %p643_p6 = por %p130_p4, %p129_p3 }
   0xa   : > { %p412_p7 = scmp.ge.s32.totalorder %s571_s18, 1  ;;  %p164_p8 = scmp.lt.s32.totalorder %s571_s18, 3 }
   0xc   : > { %p165_p9 = pnand %p412_p7, %p164_p8 }
   0xd   : > { %p188_p10 = scmp.lt.s32.totalorder (!%p165_p9), %s622_s19, 1  ;;  %s573_s14 = smov (!%p165_p9), 32  }
   0xe   : > { %168 = sbr.rel (%p165_p9) target bundleno = 303 (0x12f), region = 36  ;;  %s574_s20 = smov (!%p165_p9), 96  }
   0xf   : > { %s575_s29 = smov (!%p165_p9), 64   ;;  %s350_s23 = scalar_lea.hbm (!%p165_p9), %s729_s4, %s622_s19 }
  0x10   : > { %s529_s10 = scalar_lea.hbm (!%p165_p9), %s729_s4, 2 }
  0x13   : > { %v464_v0 = vld [vmem:[%s726_s1 + $0x38] sm:$0xff]  ;;  %v466_v1 = vld [vmem:[%s726_s1 + $0x48] sm:$0xff]  ;;  %s189_s5 = scalar_select %p188_p10, %s622_s19, 1  ;;  %v463_v2 = vld [vmem:[%s726_s1 + $0x30] sm:$0xff]  ;;  %vm210_vm0 = vcmask 261120   ;;  %vm212_vm1 = vcmask 523264  }
  0x14   : > { %301 = vmatpush.bf16.msra.mxu0 %v464_v0  ;;  %320 = vmatpush.bf16.msra.mxu1 %v466_v1  ;;  %v462_v4 = vld [vmem:[%s726_s1 + $0x28] sm:$0xff]  ;;  %v461_v7 = vld [vmem:[%s726_s1 + $0x20] sm:$0xff]  ;;  %v460_v9 = vld [vmem:[%s726_s1 + $0x18] sm:$0xff]  ;;  %vm214_vm2 = vcmask 785408   ;;  %vm339_vm3 = vcmask 253952  }
  0x15   : > { %s413_s8 = sshll.u32 %s189_s5, 3  ;;  %v459_v10 = vld [vmem:[%s726_s1 + $0x10] sm:$0xff]  ;;  %v465_v11 = vld [vmem:[%s726_s1 + $0x40] sm:$0xff]  ;;  %v458_v13 = vld [vmem:[%s726_s1 + $0x8] sm:$0xff]  ;;  %s354_s5 = sshll.u32 %s350_s23, 4  ;;  %s355_s5 = int_to_ptr.hbm [resolvable:$true] %s354_s5 }
  0x16   : > { %s191_s11 = scalar_lea.vmem %s725_s0, %s413_s8  ;;  %v457_v15 = vld [vmem:[%s726_s1] sm:$0xff]  ;;  %s523_s7 = sshra.s32 %s355_s5, 4  ;;  %s524_s7 = int_to_ptr.hbm [resolvable:$true] %s523_s7 }
  0x17   : > { %v193_v3 = vld [vmem:[%s191_s11] sm:$0xff]  ;;  %s525_s8 = scalar_lea.hbm %s524_s7, 1  ;;  %p530_p0 = scmp.lt.s32.totalorder %s524_s7, %s729_s4 }
  0x18   : > { %302 = vmatpush.bf16.msra.mxu0 %v463_v2  ;;  %v194_v5 = vrot.slane %v193_v3, 1  ;;  %v196_v6 = vrot.slane %v193_v3, 3  ;;  %v195_v8 = vrot.slane %v193_v3, 2  ;;  %v197_v12 = vrot.slane %v193_v3, 4  ;;  %321 = vmatpush.bf16.msra.mxu1 %v465_v11  ;;  %v327_v26 = vld [vmem:[%s728_s3] sm:$0xff]  ;;  %p526_p11 = scmp.ne.s32.totalorder %s524_s7, %s525_s8  ;;  %p531_p1 = scmp.lt.s32.totalorder %s529_s10, %s525_s8 }
  0x19   : > { %v336_v36 = vld [vmem:[%s727_s2] sm:$0x1] }
  0x1a   : > { %199 = vrot.lane.b32.xlu0 %v194_v5, %s573_s14  ;;  %207 = vrot.lane.b32.xlu1 %v196_v6, %s574_s20  ;;  %v217_v14 = vpack.c.bf16 %v197_v12, %v197_v12  ;;  %s186_s14 = sand.u32 1, %s563_s16   ;;  %p527_p12 = pnand %p526_p11, %p639_p5 }
  0x1b   : > { %s342_s6 = scalar_lea.sflag [#allocation3], %s186_s14  ;;  %p532_p2 = por %p531_p1, %p530_p0 }
  0x1c   : > { %303 = vmatpush.bf16.msra.mxu0 %v462_v4  ;;  %454 = vmatmul.msk.bf16.vlgmr.msra.gmra.mxu1 %vm210_vm0, %v217_v14  ;;  %p528_p13 = pneg %p527_p12 }
  0x1e   : > { %p533_p3 = pnand %p532_p2, %p528_p13 }
  0x20   : > { %304 = vmatpush.bf16.msra.mxu0 %v461_v7 }
  0x22   : > { %203 = vrot.lane.b32.xlu0 %v195_v8, %s575_s29  ;;  %s187_s29 = scalar_lea.vmem [#allocation2], %s186_s14 }
  0x23   : > { %s352_s30 = sshll.u32 %s187_s29, 4  ;;  %s353_s30 = int_to_ptr.vmem [resolvable:$true] %s352_s30 }
  0x24   : > { %305 = vmatpush.bf16.msra.mxu0 %v460_v9 }
  0x28   : > { %306 = vmatpush.bf16.msra.mxu0 %v459_v10 }
  0x2c   : > { %307 = vmatpush.bf16.msra.mxu0 %v458_v13 }
  0x30   : > { %308 = vmatpush.bf16.msra.mxu0 %v457_v15 }
  0x8c   : > { %v200_v16 = vpop.permute.xlu0 %199  ;;  %v208_v17 = vpop.permute.xlu1 %207 }
  0x8d   : > { %v211_v18 = vsel %vm210_vm0, %v193_v3, %v200_v16 }
  0x94   : > { %v204_v19 = vpop.permute.xlu0 %203 }
  0x95   : > { %v213_v20 = vsel %vm212_vm1, %v211_v18, %v204_v19 }
  0x96   : > { %v215_v21 = vsel %vm214_vm2, %v213_v20, %v208_v17 }
  0x97   : > { %v216_v22 = vpack.c.bf16 %v215_v21, %v215_v21 }
  0x99   : > { %309 = vmatmul.bf16.vlgmr.msra.gmra.mxu0 %v216_v22  ;;  %v323_v23 = vpop.f32.mrf.mxu1 }
  0xa1   : > { %v325_v24 = vpop.f32.mrf.mxu1 }
 0x116   : > { %v310_v25 = vpop.f32.mrf.mxu0 }
 0x117   : > { %v324_v27 = vadd.f32 %v323_v23, %v310_v25 }
 0x119   : > { %v328_v28 = vadd.f32 %v327_v26, %v324_v27 }
 0x11b   : > { %v329_v29 = vsel %vm210_vm0, %v328_v28, -inf }
 0x11c   : > { %v330_v30 = vrot.slane %v329_v29, 4 }
 0x11e   : > { %v331_v31 = vmax.f32 %v329_v29, %v330_v30  ;;  %v312_v32 = vpop.f32.mrf.mxu0 }
 0x120   : > { %v332_v33 = vrot.slane %v331_v31, 2 }
 0x122   : > { %v333_v34 = vmax.f32 %v331_v31, %v332_v33 }
 0x124   : > { %v334_v35 = vrot.slane %v333_v34, 1 }
 0x126   : > { %v335_v37 = vmax.f32 %v333_v34, %v334_v35 }
 0x128   : > { %v337_v38 = vadd.f32 %v336_v36, %v335_v37 }
 0x12a   : > { %v338_v39 = vmax.f32 %v337_v38, 0.0 }
 0x12c   : > { %340 = vst.msk [vmem:[%s187_s29] sm:$0x1] %vm339_vm3, %v338_v39 }
 0x12d   : > { %536 = shalt.err (!%p533_p3)
}
 0x12e   : > { %467 = dma.vmem_to_hbm [thread:$0]  (%p639_p5), %s353_s30, 16, %s355_s5, %s342_s6  }
 0x12f PF: > { %p473_p4 = scmp.ge.s32.totalorder %s571_s18, 2  ;;  %s366_s13 = sand.u32 1, %s559_s15  }
 0x130   : > { %s367_s14 = scalar_lea.sflag [#allocation3], %s366_s13 }
 0x131   : > { %p470_p7 = pnand %p473_p4, %p643_p6 }
 0x133   : > { %p471_p8 = pneg %p470_p7 }
 0x135   : > { %554 = dma.done.wait (%p471_p8), %s367_s14, 16  }
 0x136   : > { %556 = vsyncadd (%p471_p8), %s367_s14, 4294967280  ;;  %p14_p9 = scmp.ge.s32.totalorder %s626_s21, 4   ;;  %s732_s15 = smov %s563_s16 }
 0x137   : > { %s733_s16 = smov %s567_s17  ;;  %s734_s17 = smov %s637_s24 }
 0x138   : > { %s735_s18 = smov %s626_s21  ;;  %16 = sbr.rel (!%p14_p9) target bundleno = 3 (0x3), region = 71 }
 0x13d   :  { %372 = vsyncpa [#allocation3], 1 }
 0x13e   :  { %374 = vsyncpa [#allocation3 + $0x1], 1 }

// kernel: tpu_custom_call.1
= control target key start
LH: loop header
LB: loop body
LE: loop exit
PB: predicated region body
PF: predicated region fallthrough
CT: control target
= control target key end

     0   :  { %9 = vsyncpa [#allocation3], 0  ;;  %s725_s0 = inlined_call_operand.vmem [shape: f32[2,8,32], index: 0, kind: input, shape index: {}]   ;;  %s726_s1 = inlined_call_operand.vmem [shape: bf16[160,32], index: 1, kind: input, shape index: {}]   ;;  %s727_s2 = inlined_call_operand.vmem [shape: f32[1,32], index: 2, kind: input, shape index: {}]   ;;  %s728_s3 = inlined_call_operand.vmem [shape: f32[1,8,32], index: 3, kind: input, shape index: {}]   ;;  %s729_s4 = inlined_call_operand.hbm [shape: f32[2,1,32], index: 4, kind: output, shape index: {}]  }
   0x1   :  { %11 = vsyncpa [#allocation3 + $0x1], 0  ;;  %s601_s15 = smov 0   ;;  %s603_s16 = smov 0  }
   0x2   :  { %s605_s17 = smov 0   ;;  %s607_s18 = smov 0  }
   0x3 LB: > { %s622_s19 = sadd.s32 4294967295, %s571_s18   ;;  %s409_s20 = sadd.s32 4294967294, %s571_s18   ;;  %s571_s18 = sphi %s607_s18, %s735_s18   ;;  %s567_s17 = sphi %s605_s17, %s734_s17   ;;  %s563_s16 = sphi %s603_s16, %s733_s16   ;;  %s559_s15 = sphi %s601_s15, %s732_s15  }
   0x4   : > { %s626_s21 = sadd.s32 1, %s571_s18   ;;  %s113_s22 = sadd.s32 1, %s567_s17 }
   0x5   : > { %s110_s23 = ssub.s32 %s571_s18, %s626_s21  ;;  %p123_p0 = scmp.ne.s32.totalorder %s567_s17, %s563_s16 }
   0x6   : > { %p111_p1 = scmp.eq.s32.totalorder %s110_s23, 0  ;;  %p124_p2 = scmp.eq.s32.totalorder %s622_s19, 1 }
   0x7   : > { %p129_p3 = scmp.ne.s32.totalorder %s563_s16, %s559_s15  ;;  %p130_p4 = scmp.eq.s32.totalorder %s409_s20, 1 }
   0x8   : > { %s637_s24 = scalar_select %p111_p1, %s567_s17, %s113_s22  }
   0x9   : > { %p639_p5 = por %p124_p2, %p123_p0  ;;  %p643_p6 = por %p130_p4, %p129_p3 }
   0xa   : > { %p412_p7 = scmp.ge.s32.totalorder %s571_s18, 1  ;;  %p164_p8 = scmp.lt.s32.totalorder %s571_s18, 3 }
   0xc   : > { %p165_p9 = pnand %p412_p7, %p164_p8 }
   0xd   : > { %p188_p10 = scmp.lt.s32.totalorder (!%p165_p9), %s622_s19, 1  ;;  %s573_s14 = smov (!%p165_p9), 32  }
   0xe   : > { %168 = sbr.rel (%p165_p9) target bundleno = 303 (0x12f), region = 36  ;;  %s574_s20 = smov (!%p165_p9), 96  }
   0xf   : > { %s575_s29 = smov (!%p165_p9), 64   ;;  %s350_s23 = scalar_lea.hbm (!%p165_p9), %s729_s4, %s622_s19 }
  0x10   : > { %s529_s10 = scalar_lea.hbm (!%p165_p9), %s729_s4, 2 }
  0x13   : > { %v464_v0 = vld [vmem:[%s726_s1 + $0x38] sm:$0xff]  ;;  %v466_v1 = vld [vmem:[%s726_s1 + $0x48] sm:$0xff]  ;;  %s189_s5 = scalar_select %p188_p10, %s622_s19, 1  ;;  %v463_v2 = vld [vmem:[%s726_s1 + $0x30] sm:$0xff]  ;;  %vm210_vm0 = vcmask 261120   ;;  %vm212_vm1 = vcmask 523264  }
  0x14   : > { %301 = vmatpush.bf16.msra.mxu0 %v464_v0  ;;  %320 = vmatpush.bf16.msra.mxu1 %v466_v1  ;;  %v462_v4 = vld [vmem:[%s726_s1 + $0x28] sm:$0xff]  ;;  %v461_v7 = vld [vmem:[%s726_s1 + $0x20] sm:$0xff]  ;;  %v460_v9 = vld [vmem:[%s726_s1 + $0x18] sm:$0xff]  ;;  %vm214_vm2 = vcmask 785408   ;;  %vm339_vm3 = vcmask 253952  }
  0x15   : > { %s413_s8 = sshll.u32 %s189_s5, 3  ;;  %v459_v10 = vld [vmem:[%s726_s1 + $0x10] sm:$0xff]  ;;  %v465_v11 = vld [vmem:[%s726_s1 + $0x40] sm:$0xff]  ;;  %v458_v13 = vld [vmem:[%s726_s1 + $0x8] sm:$0xff]  ;;  %s354_s5 = sshll.u32 %s350_s23, 4  ;;  %s355_s5 = int_to_ptr.hbm [resolvable:$true] %s354_s5 }
  0x16   : > { %s191_s11 = scalar_lea.vmem %s725_s0, %s413_s8  ;;  %v457_v15 = vld [vmem:[%s726_s1] sm:$0xff]  ;;  %s523_s7 = sshra.s32 %s355_s5, 4  ;;  %s524_s7 = int_to_ptr.hbm [resolvable:$true] %s523_s7 }
  0x17   : > { %v193_v3 = vld [vmem:[%s191_s11] sm:$0xff]  ;;  %s525_s8 = scalar_lea.hbm %s524_s7, 1  ;;  %p530_p0 = scmp.lt.s32.totalorder %s524_s7, %s729_s4 }
  0x18   : > { %302 = vmatpush.bf16.msra.mxu0 %v463_v2  ;;  %v194_v5 = vrot.slane %v193_v3, 1  ;;  %v196_v6 = vrot.slane %v193_v3, 3  ;;  %v195_v8 = vrot.slane %v193_v3, 2  ;;  %v197_v12 = vrot.slane %v193_v3, 4  ;;  %321 = vmatpush.bf16.msra.mxu1 %v465_v11  ;;  %v327_v26 = vld [vmem:[%s728_s3] sm:$0xff]  ;;  %p526_p11 = scmp.ne.s32.totalorder %s524_s7, %s525_s8  ;;  %p531_p1 = scmp.lt.s32.totalorder %s529_s10, %s525_s8 }
  0x19   : > { %v336_v36 = vld [vmem:[%s727_s2] sm:$0x1] }
  0x1a   : > { %199 = vrot.lane.b32.xlu0 %v194_v5, %s573_s14  ;;  %207 = vrot.lane.b32.xlu1 %v196_v6, %s574_s20  ;;  %v217_v14 = vpack.c.bf16 %v197_v12, %v197_v12  ;;  %s186_s14 = sand.u32 1, %s563_s16   ;;  %p527_p12 = pnand %p526_p11, %p639_p5 }
  0x1b   : > { %s342_s6 = scalar_lea.sflag [#allocation3], %s186_s14  ;;  %p532_p2 = por %p531_p1, %p530_p0 }
  0x1c   : > { %303 = vmatpush.bf16.msra.mxu0 %v462_v4  ;;  %454 = vmatmul.msk.bf16.vlgmr.msra.gmra.mxu1 %vm210_vm0, %v217_v14  ;;  %p528_p13 = pneg %p527_p12 }
  0x1e   : > { %p533_p3 = pnand %p532_p2, %p528_p13 }
  0x20   : > { %304 = vmatpush.bf16.msra.mxu0 %v461_v7 }
  0x22   : > { %203 = vrot.lane.b32.xlu0 %v195_v8, %s575_s29  ;;  %s187_s29 = scalar_lea.vmem [#allocation2], %s186_s14 }
  0x23   : > { %s352_s30 = sshll.u32 %s187_s29, 4  ;;  %s353_s30 = int_to_ptr.vmem [resolvable:$true] %s352_s30 }
  0x24   : > { %305 = vmatpush.bf16.msra.mxu0 %v460_v9 }
  0x28   : > { %306 = vmatpush.bf16.msra.mxu0 %v459_v10 }
  0x2c   : > { %307 = vmatpush.bf16.msra.mxu0 %v458_v13 }
  0x30   : > { %308 = vmatpush.bf16.msra.mxu0 %v457_v15 }
  0x8c   : > { %v200_v16 = vpop.permute.xlu0 %199  ;;  %v208_v17 = vpop.permute.xlu1 %207 }
  0x8d   : > { %v211_v18 = vsel %vm210_vm0, %v193_v3, %v200_v16 }
  0x94   : > { %v204_v19 = vpop.permute.xlu0 %203 }
  0x95   : > { %v213_v20 = vsel %vm212_vm1, %v211_v18, %v204_v19 }
  0x96   : > { %v215_v21 = vsel %vm214_vm2, %v213_v20, %v208_v17 }
  0x97   : > { %v216_v22 = vpack.c.bf16 %v215_v21, %v215_v21 }
  0x99   : > { %309 = vmatmul.bf16.vlgmr.msra.gmra.mxu0 %v216_v22  ;;  %v323_v23 = vpop.f32.mrf.mxu1 }
  0xa1   : > { %v325_v24 = vpop.f32.mrf.mxu1 }
 0x116   : > { %v310_v25 = vpop.f32.mrf.mxu0 }
 0x117   : > { %v324_v27 = vadd.f32 %v323_v23, %v310_v25 }
 0x119   : > { %v328_v28 = vadd.f32 %v327_v26, %v324_v27 }
 0x11b   : > { %v329_v29 = vsel %vm210_vm0, %v328_v28, -inf }
 0x11c   : > { %v330_v30 = vrot.slane %v329_v29, 4 }
 0x11e   : > { %v331_v31 = vmax.f32 %v329_v29, %v330_v30  ;;  %v312_v32 = vpop.f32.mrf.mxu0 }
 0x120   : > { %v332_v33 = vrot.slane %v331_v31, 2 }
 0x122   : > { %v333_v34 = vmax.f32 %v331_v31, %v332_v33 }
 0x124   : > { %v334_v35 = vrot.slane %v333_v34, 1 }
 0x126   : > { %v335_v37 = vmax.f32 %v333_v34, %v334_v35 }
 0x128   : > { %v337_v38 = vadd.f32 %v336_v36, %v335_v37 }
 0x12a   : > { %v338_v39 = vmax.f32 %v337_v38, 0.0 }
 0x12c   : > { %340 = vst.msk [vmem:[%s187_s29] sm:$0x1] %vm339_vm3, %v338_v39 }
 0x12d   : > { %536 = shalt.err (!%p533_p3)
}
 0x12e   : > { %467 = dma.vmem_to_hbm [thread:$0]  (%p639_p5), %s353_s30, 16, %s355_s5, %s342_s6  }
 0x12f PF: > { %p473_p4 = scmp.ge.s32.totalorder %s571_s18, 2  ;;  %s366_s13 = sand.u32 1, %s559_s15  }
 0x130   : > { %s367_s14 = scalar_lea.sflag [#allocation3], %s366_s13 }
 0x131   : > { %p470_p7 = pnand %p473_p4, %p643_p6 }
 0x133   : > { %p471_p8 = pneg %p470_p7 }
 0x135   : > { %554 = dma.done.wait (%p471_p8), %s367_s14, 16  }
 0x136   : > { %556 = vsyncadd (%p471_p8), %s367_s14, 4294967280  ;;  %p14_p9 = scmp.ge.s32.totalorder %s626_s21, 4   ;;  %s732_s15 = smov %s563_s16 }
 0x137   : > { %s733_s16 = smov %s567_s17  ;;  %s734_s17 = smov %s637_s24 }
 0x138   : > { %s735_s18 = smov %s626_s21  ;;  %16 = sbr.rel (!%p14_p9) target bundleno = 3 (0x3), region = 71 }
 0x13d   :  { %372 = vsyncpa [#allocation3], 1 }
 0x13e   :  { %374 = vsyncpa [#allocation3 + $0x1], 1 }

</bundles_post_ra>
